<compile_context>
chip_gen: v7x
topology: tpu7x:2x2x1
jax: 0.10.0
libtpu: 0.0.40
codegen_flags: <defaults>
</compile_context>

<pallas_src>
import functools
import random

import jax
import jax.numpy as jnp
from jax import lax
from jax.experimental import pallas as pl
from jax.experimental.pallas import tpu as pltpu

_EPS = 1e-6   # F.pairwise_distance default eps (added to the difference)


def _round_up(x, m):
    return ((x + m - 1) // m) * m


def _ceil_div(a, b):
    return -(-a // b)


def _vmem_limit_bytes():
    """Explicit scoped-VMEM budget (defaults are only 16/32 MiB of physical)."""
    mib = 1024 * 1024
    try:
        cap = int(pltpu.get_tpu_info().vmem_capacity_bytes)
    except Exception:
        cap = 64 * mib                     # v7x physical; conservative fallback
    return max(min(cap - 16 * mib, 100 * mib), 32 * mib)


# ---------------------------------------------------------------------------
# Call 1: pairwise distance matrix over a ("parallel", "parallel") tile grid.
# ---------------------------------------------------------------------------
def _dist_kernel(xr_ref, xc_ref, dist_ref, *, d_real, gram_dtype):
    xr = xr_ref[...]                        # (tm, D_pad) anchor rows
    xc = xc_ref[...]                        # (tn, D_pad) other rows
    xr32 = xr.astype(jnp.float32)
    xc32 = xc.astype(jnp.float32)

    # Gram cross term on the MXU (bf16 inputs, f32 accumulation by default).
    g = lax.dot_general(xr.astype(gram_dtype), xc.astype(gram_dtype),
                        (((1,), (1,)), ((), ())),
                        preferred_element_type=jnp.float32)          # (tm, tn)

    # Row/col norm terms + exact f32 rank-1 eps correction (zero-padded
    # feature columns contribute nothing to either sum).
    alpha = jnp.sum(xr32 * xr32 + (2.0 * _EPS) * xr32,
                    axis=-1, keepdims=True)                          # (tm, 1)
    ones_row = jnp.ones((1, xc32.shape[-1]), jnp.float32)
    beta = lax.dot_general(ones_row, xc32 * xc32 - (2.0 * _EPS) * xc32,
                           (((1,), (1,)), ((), ())),
                           preferred_element_type=jnp.float32)       # (1, tn)

    d2 = alpha + beta - 2.0 * g + jnp.float32(d_real) * (_EPS * _EPS)
    dist_ref[...] = jnp.sqrt(jnp.maximum(d2, 0.0))


def _pairwise_dist_matrix(x_pad, d_real, gram_dtype):
    b_pad, d_pad = x_pad.shape
    tm = 256 if b_pad % 256 == 0 else 128   # b_pad is a multiple of 128
    tn = tm
    kernel = functools.partial(_dist_kernel, d_real=d_real, gram_dtype=gram_dtype)
    return pl.pallas_call(
        kernel,
        out_shape=jax.ShapeDtypeStruct((b_pad, b_pad), jnp.float32),
        grid=(b_pad // tm, b_pad // tn),
        in_specs=[pl.BlockSpec((tm, d_pad), lambda i, j: (i, 0)),
                  pl.BlockSpec((tn, d_pad), lambda i, j: (j, 0))],
        out_specs=pl.BlockSpec((tm, tn), lambda i, j: (i, j)),
        compiler_params=pltpu.CompilerParams(
            dimension_semantics=("parallel", "parallel"),
            vmem_limit_bytes=_vmem_limit_bytes()),
    )(x_pad, x_pad)


# ---------------------------------------------------------------------------
# Call 2: triplet gather + softplus reduction over a ("parallel",) tile grid.
# ---------------------------------------------------------------------------
def _triplet_reduce_kernel(count_ref, idx_ref, dist_ref, out_ref):
    # count_ref : SMEM (1,) int32            -- number of valid triplets
    # idx_ref   : VMEM (tile_t, 3) int32     -- [anchor, positive, negative]
    # dist_ref  : VMEM (B_pad, B_pad) f32    -- resident across all tiles
    # out_ref   : VMEM (1, 8, 128) f32       -- this tile's partial sum
    pid = pl.program_id(0)
    tile_t = idx_ref.shape[0]
    b_pad = dist_ref.shape[0]

    idx = idx_ref[...]                                             # (tile_t, 3)
    col_ids = lax.broadcasted_iota(jnp.int32, (tile_t, b_pad), 1)
    a_oh = (idx[:, 0:1] == col_ids).astype(jnp.float32)
    # Combined (positive - negative) selector; padded dist columns never match.
    sel = ((idx[:, 1:2] == col_ids).astype(jnp.float32)
           - (idx[:, 2:3] == col_ids).astype(jnp.float32))

    # Gather anchor rows of dist with one MXU matmul, then
    # dp - dn = sum_j dist[a, j] * (p_onehot - n_onehot)[j]   (lane-dense).
    d_anchor = jnp.dot(a_oh, dist_ref[...], preferred_element_type=jnp.float32)
    spread = jnp.sum(d_anchor * sel, axis=-1, keepdims=True)        # (tile_t,1)

    # Stable softplus: log(1 + exp(x)) = max(x, 0) + log1p(exp(-|x|)).
    sp = jnp.maximum(spread, 0.0) + jnp.log1p(jnp.exp(-jnp.abs(spread)))

    # Mask padded triplet rows (count comes in via scalar prefetch so a
    # varying number of triplets per batch does not force recompiles).
    row_ids = lax.broadcasted_iota(jnp.int32, (tile_t, 1), 0) + pid * tile_t
    sp = jnp.where(row_ids < count_ref[0], sp, 0.0)

    out_ref[...] = jnp.full(out_ref.shape, jnp.sum(sp), jnp.float32)


def _pick_tile_t(t, b_pad):
    # Keep ~5 live (tile_t, b_pad) f32 temporaries under ~16 MiB of VMEM.
    cap = max(256, (16 * 1024 * 1024) // (20 * b_pad))
    tile = min(1024, cap, _round_up(max(t, 1), 8))
    return _round_up(tile, 8)


def triplet_loss_with_exp_pallas(features, a_idx, p_idx, n_idx, *,
                                 gram_dtype=jnp.bfloat16):
    """features: (B, D) f32/bf16; a_idx/p_idx/n_idx: (T,) int. -> scalar f32."""
    b, d = features.shape
    t = int(a_idx.shape[0])
    if t == 0:
        return jnp.float32(0.0)

    # Pad B and D to multiples of 128 so lanes are dense everywhere.
    b_pad = _round_up(b, 128)
    d_pad = _round_up(d, 128)
    x = features
    if (b_pad, d_pad) != (b, d):
        x = jnp.pad(x, ((0, b_pad - b), (0, d_pad - d)))

    # ---- Call 1: (B_pad, B_pad) distance matrix ---------------------------
    dist = _pairwise_dist_matrix(x, d_real=d, gram_dtype=gram_dtype)

    # ---- Call 2: gather + softplus reduction over triplet tiles -----------
    tile_t = _pick_tile_t(t, b_pad)
    num_tiles = _ceil_div(t, tile_t)
    t_pad = num_tiles * tile_t

    idx = jnp.stack([a_idx.astype(jnp.int32),
                     p_idx.astype(jnp.int32),
                     n_idx.astype(jnp.int32)], axis=1)               # (t, 3)
    if t_pad != t:
        idx = jnp.pad(idx, ((0, t_pad - t), (0, 0)))
    count = jnp.array([t], dtype=jnp.int32)

    partials = pl.pallas_call(
        _triplet_reduce_kernel,
        out_shape=jax.ShapeDtypeStruct((num_tiles, 8, 128), jnp.float32),
        grid_spec=pltpu.PrefetchScalarGridSpec(
            num_scalar_prefetch=1,
            grid=(num_tiles,),
            in_specs=[
                pl.BlockSpec((tile_t, 3), lambda i, c: (i, 0)),
                # Full distance matrix, same block every step -> loaded once.
                pl.BlockSpec((b_pad, b_pad), lambda i, c: (0, 0)),
            ],
            out_specs=pl.BlockSpec((1, 8, 128), lambda i, c: (i, 0, 0)),
        ),
        compiler_params=pltpu.CompilerParams(
            dimension_semantics=("parallel",),
            vmem_limit_bytes=_vmem_limit_bytes()),
    )(count, idx, dist)

    total = jnp.sum(partials[:, 0, 0])
    return total / jnp.float32(t)


# ---------------------------------------------------------------------------
# Host-side triplet sampling (mirrors TripletLossWithExp.sample_triplets).
# ---------------------------------------------------------------------------
def sample_triplet_indices(labels):
    label_to_indices = {}
    for idx, label in enumerate(labels):
        label_to_indices.setdefault(int(label), []).append(idx)

    triplets = []
    for label, indices in label_to_indices.items():
        if len(indices) < 2:
            continue
        negative_labels = [l for l in label_to_indices.keys() if l != label]
        if not negative_labels:
            continue
        for anchor_idx in indices:
            for positive_idx in indices:
                if anchor_idx == positive_idx:
                    continue
                negative_label = random.choice(negative_labels)
                negative_idx = random.choice(label_to_indices[negative_label])
                triplets.append((anchor_idx, positive_idx, negative_idx))
    return triplets


def triplet_loss_with_exp(features, labels, *, gram_dtype=jnp.bfloat16):
    """features: (batch, embedding_dim) jnp array; labels: python/np/jnp ints."""
    triplets = sample_triplet_indices(labels)
    if not triplets:
        return jnp.float32(0.0)
    a_idx = jnp.array([t[0] for t in triplets], dtype=jnp.int32)
    p_idx = jnp.array([t[1] for t in triplets], dtype=jnp.int32)
    n_idx = jnp.array([t[2] for t in triplets], dtype=jnp.int32)
    return triplet_loss_with_exp_pallas(features, a_idx, p_idx, n_idx,
                                        gram_dtype=gram_dtype)


if __name__ == "__main__":
    random.seed(0)  # the reference uses `random` for negative sampling

    batch_size = 8
    embedding_dim = 32

    key = jax.random.PRNGKey(0)
    features = jax.random.normal(key, (batch_size, embedding_dim), jnp.float32)
    # 3 classes, each with >= 2 samples -> guaranteed non-empty triplet set.
    labels = [0, 0, 1, 1, 2, 2, 0, 1]

    trips = sample_triplet_indices(labels)
    assert trips, "expected a non-empty triplet set"
    a_idx = jnp.array([t[0] for t in trips], dtype=jnp.int32)
    p_idx = jnp.array([t[1] for t in trips], dtype=jnp.int32)
    n_idx = jnp.array([t[2] for t in trips], dtype=jnp.int32)

    # Pure-JAX reference of the hot path (PyTorch F.pairwise_distance p=2).
    a, p, n = features[a_idx], features[p_idx], features[n_idx]
    dp = jnp.sqrt(jnp.sum((a - p + _EPS) ** 2, axis=-1))
    dn = jnp.sqrt(jnp.sum((a - n + _EPS) ** 2, axis=-1))
    ref = jnp.mean(jnp.log1p(jnp.exp(dp - dn)))

    # f32 Gram path: matches the reference to f32 accuracy.
    loss_f32 = triplet_loss_with_exp_pallas(features, a_idx, p_idx, n_idx,
                                            gram_dtype=jnp.float32)
    jax.block_until_ready(loss_f32)
    assert jnp.allclose(loss_f32, ref, rtol=1e-4, atol=1e-4), (loss_f32, ref)

    # Default bf16-MXU Gram path (eps handled as an exact f32 correction);
    # tolerance reflects bf16 rounding of the cross term on O(8) distances.
    loss_bf16 = triplet_loss_with_exp_pallas(features, a_idx, p_idx, n_idx)
    jax.block_until_ready(loss_bf16)
    assert jnp.allclose(loss_bf16, ref, rtol=5e-2, atol=5e-2), (loss_bf16, ref)

    # Exercise the full module-equivalent entry point (fresh negative samples).
    loss_module = triplet_loss_with_exp(features, labels)
    jax.block_until_ready(loss_module)

    print("KERNEL_OK")
</pallas_src>

<mosaic_0001>
module attributes {stable_mosaic.version = 11 : i64} {
  func.func @_dist_kernel(%arg0: i32, %arg1: i32, %arg2: memref<128x128xf32, #tpu.memory_space<vmem>>, %arg3: memref<128x128xf32, #tpu.memory_space<vmem>>, %arg4: memref<128x128xf32, #tpu.memory_space<vmem>>) attributes {dimension_semantics = [#tpu.dimension_semantics<parallel>, #tpu.dimension_semantics<parallel>], iteration_bounds = array<i64: 1, 1>, scalar_prefetch = 0 : i64, scratch_operands = 0 : i64, tpu.core_type = #tpu.core_type<tc>, window_params = [{transform_indices = @transform_0, window_bounds = array<i64: 128, 128>}, {transform_indices = @transform_1, window_bounds = array<i64: 128, 128>}, {transform_indices = @transform_2, window_bounds = array<i64: 128, 128>}]} {
    %c0 = arith.constant 0 : index
    %c0_0 = arith.constant 0 : index
    %0 = vector.load %arg2[%c0, %c0_0] : memref<128x128xf32, #tpu.memory_space<vmem>>, vector<128x128xf32>
    %c0_1 = arith.constant 0 : index
    %c0_2 = arith.constant 0 : index
    %1 = vector.load %arg3[%c0_1, %c0_2] : memref<128x128xf32, #tpu.memory_space<vmem>>, vector<128x128xf32>
    %cst = arith.constant dense<0.000000e+00> : vector<128x128xf32>
    %2 = tpu.matmul %0, %1, %cst {dimension_numbers = #tpu.dot_dimension_numbers<[1], [1], [0], [0], [0, 0, 1, 0], [], []>} : vector<128x128xf32>, vector<128x128xf32>, vector<128x128xf32> -> vector<128x128xf32>
    %3 = arith.mulf %0, %0 : vector<128x128xf32>
    %cst_3 = arith.constant 2.000000e-06 : f32
    %4 = vector.broadcast %cst_3 : f32 to vector<128x128xf32>
    %5 = arith.mulf %4, %0 : vector<128x128xf32>
    %6 = arith.addf %3, %5 : vector<128x128xf32>
    %cst_4 = arith.constant dense<0.000000e+00> : vector<128xf32>
    %7 = vector.multi_reduction <add>, %6, %cst_4 [1] : vector<128x128xf32> to vector<128xf32>
    %8 = vector.shape_cast %7 : vector<128xf32> to vector<128x1xf32>
    %cst_5 = arith.constant 1.000000e+00 : f32
    %9 = vector.broadcast %cst_5 : f32 to vector<1x128xf32>
    %10 = arith.mulf %1, %1 : vector<128x128xf32>
    %cst_6 = arith.constant 2.000000e-06 : f32
    %11 = vector.broadcast %cst_6 : f32 to vector<128x128xf32>
    %12 = arith.mulf %11, %1 : vector<128x128xf32>
    %13 = arith.subf %10, %12 : vector<128x128xf32>
    %cst_7 = arith.constant dense<0.000000e+00> : vector<1x128xf32>
    %14 = tpu.matmul %9, %13, %cst_7 {dimension_numbers = #tpu.dot_dimension_numbers<[1], [1], [0], [0], [0, 0, 1, 0], [], []>} : vector<1x128xf32>, vector<128x128xf32>, vector<1x128xf32> -> vector<1x128xf32>
    %15 = vector.broadcast %8 : vector<128x1xf32> to vector<128x128xf32>
    %16 = vector.broadcast %14 : vector<1x128xf32> to vector<128x128xf32>
    %17 = arith.addf %15, %16 : vector<128x128xf32>
    %cst_8 = arith.constant 2.000000e+00 : f32
    %18 = vector.broadcast %cst_8 : f32 to vector<128x128xf32>
    %19 = arith.mulf %18, %2 : vector<128x128xf32>
    %20 = arith.subf %17, %19 : vector<128x128xf32>
    %cst_9 = arith.constant 3.200000e+01 : f32
    %cst_10 = arith.constant 9.99999996E-13 : f32
    %21 = arith.mulf %cst_9, %cst_10 : f32
    %22 = vector.broadcast %21 : f32 to vector<128x128xf32>
    %23 = arith.addf %20, %22 : vector<128x128xf32>
    %cst_11 = arith.constant 0.000000e+00 : f32
    %24 = vector.broadcast %cst_11 : f32 to vector<128x128xf32>
    %25 = arith.maximumf %23, %24 : vector<128x128xf32>
    %26 = math.sqrt %25 : vector<128x128xf32>
    %c0_12 = arith.constant 0 : index
    %c0_13 = arith.constant 0 : index
    %27 = vector.load %arg4[%c0_12, %c0_13] : memref<128x128xf32, #tpu.memory_space<vmem>>, vector<128x128xf32>
    tpu.vector_store %arg4[%c0_12, %c0_13], %26 {strides = array<i32>} : memref<128x128xf32, #tpu.memory_space<vmem>>, vector<128x128xf32>,
    return
  }
  func.func @transform_0(%arg0: i32, %arg1: i32) -> (i32, i32) {
    %c0_i32 = arith.constant 0 : i32
    %c0_i32_0 = arith.constant 0 : i32
    return %arg0, %c0_i32 : i32, i32
  }
  func.func @transform_1(%arg0: i32, %arg1: i32) -> (i32, i32) {
    %c0_i32 = arith.constant 0 : i32
    %c0_i32_0 = arith.constant 0 : i32
    return %arg1, %c0_i32 : i32, i32
  }
  func.func @transform_2(%arg0: i32, %arg1: i32) -> (i32, i32) {
    %c0_i32 = arith.constant 0 : i32
    return %arg0, %arg1 : i32, i32
  }
}

</mosaic_0001>

<bundles_post_ra>
// kernel: tpu_custom_call.1
= control target key start
LH: loop header
LB: loop body
LE: loop exit
PB: predicated region body
PF: predicated region fallthrough
CT: control target
= control target key end

     0   :  { %7 = vsyncpa [#allocation3], 0  ;;  %s1279_s0 = inlined_call_operand.hbm [shape: f32[128,128], index: 0, kind: input, shape index: {}]   ;;  %s1280_s1 = inlined_call_operand.hbm [shape: f32[128,128], index: 1, kind: input, shape index: {}]   ;;  %s1281_s2 = inlined_call_operand.hbm [shape: f32[128,128], index: 2, kind: output, shape index: {}]  }
   0x1   :  { %8 = vsyncpa [#allocation6], 0 }
   0x2   :  { %9 = vsyncpa [#allocation4], 0  ;;  %s954_s9 = smov [#allocation2]   ;;  %s882_s13 = scalar_lea.hbm %s1279_s0, 2048 }
   0x3   :  { %s15_s10 = sshll.u32 %s954_s9, 4  ;;  %p883_p0 = scmp.ne.s32.totalorder %s1279_s0, %s882_s13  ;;  %s16_s10 = int_to_ptr.vmem [resolvable:$true] %s15_s10 }
   0x4   :  { %p886_p1 = scmp.lt.u32.totalorder %s882_s13, %s1279_s0 }
   0x6   :  { %p888_p2 = pnand %p886_p1, %p883_p0 }
   0x8   :  { %891 = shalt.err (!%p888_p2)
}
   0x9   :  { %s892_s18 = scalar_lea.vmem %s16_s10, 2048  ;;  %p897_p4 = scmp.lt.s32.totalorder %s16_s10, %s16_s10 }
   0xa   :  { %p893_p3 = scmp.ne.s32.totalorder %s16_s10, %s892_s18  ;;  %p898_p5 = scmp.lt.s32.totalorder %s892_s18, %s892_s18 }
   0xc   :  { %p899_p6 = por %p898_p5, %p897_p4 }
   0xe   :  { %p900_p7 = pnand %p899_p6, %p893_p3 }
  0x10   :  { %903 = shalt.err (!%p900_p7)
}
  0x11   :  { %s955_s19 = smov 128   ;;  %s956_s20 = smov 8  }
  0x12   :  { %21 = dma.hbm_to_vmem [thread:$0]  %s1279_s0, 2048, %s16_s10, [#allocation3], %s955_s19, %s955_s19, %s956_s20  }
  0x13   :  { %s957_s23 = smov [#allocation5]   ;;  %s904_s27 = scalar_lea.hbm %s1280_s1, 2048 }
  0x14   :  { %s27_s24 = sshll.u32 %s957_s23, 4  ;;  %p905_p8 = scmp.ne.s32.totalorder %s1280_s1, %s904_s27  ;;  %s28_s24 = int_to_ptr.vmem [resolvable:$true] %s27_s24 }
  0x15   :  { %p908_p9 = scmp.lt.u32.totalorder %s904_s27, %s1280_s1 }
  0x17   :  { %p910_p10 = pnand %p908_p9, %p905_p8 }
  0x19   :  { %913 = shalt.err (!%p910_p10)
}
  0x1a   :  { %s914_s4 = scalar_lea.vmem %s28_s24, 2048  ;;  %p919_p12 = scmp.lt.s32.totalorder %s28_s24, %s28_s24 }
  0x1b   :  { %p915_p11 = scmp.ne.s32.totalorder %s28_s24, %s914_s4  ;;  %p920_p13 = scmp.lt.s32.totalorder %s914_s4, %s914_s4 }
  0x1d   :  { %p921_p0 = por %p920_p13, %p919_p12 }
  0x1f   :  { %p922_p1 = pnand %p921_p0, %p915_p11 }
  0x21   :  { %925 = shalt.err (!%p922_p1)
}
  0x22   :  { %33 = dma.hbm_to_vmem [thread:$0]  %s1280_s1, 2048, %s28_s24, [#allocation6], %s955_s19, %s955_s19, %s956_s20  }
  0x23   :  { %948 = dma.done.wait [#allocation3], 2048  }
  0x24   :  { %949 = vsyncadd [#allocation3], 4294965248 }
  0x25   :  { %950 = dma.done.wait [#allocation6], 2048  }
  0x26   :  { %951 = vsyncadd [#allocation6], 4294965248  ;;  %v958_v0 = vmov 0.0|0.0   ;;  %vm959_vm0 = vmmov 0   ;;  %v960_v1 = vmov 0.0   ;;  %v56_v2 = vld [vmem:[#allocation5] sm:$0xff] }
  0x27   :  { %817 = vmatprep.subr.bf16.mxu1 %v958_v0  ;;  %782 = vmatprep.mubr.msk.f32.mxu1 %vm959_vm0, %v960_v1  ;;  %v57_v3 = vld [vmem:[#allocation5 + $0x8] sm:$0xff]  ;;  %v58_v4 = vld [vmem:[#allocation5 + $0x10] sm:$0xff]  ;;  %v297_v6 = vmul.f32 %v56_v2, %v56_v2  ;;  %v313_v8 = vmul.f32 2e-06, %v56_v2  ;;  %v59_v9 = vld [vmem:[#allocation5 + $0x18] sm:$0xff]  ;;  %s962_s1 = smov [#allocation7]  }
  0x28   :  { %v785_v5 = vpack.c.bf16 %v57_v3, %v56_v2  ;;  %v298_v7 = vmul.f32 %v57_v3, %v57_v3  ;;  %v314_v10 = vmul.f32 2e-06, %v57_v3  ;;  %v789_v11 = vpack.c.bf16 %v59_v9, %v58_v4  ;;  %v40_v18 = vld [vmem:[#allocation2] sm:$0xff]  ;;  %v61_v21 = vld [vmem:[#allocation5 + $0x28] sm:$0xff]  ;;  %v62_v30 = vld [vmem:[#allocation5 + $0x30] sm:$0xff]  ;;  %s632_s6 = sshll.u32 %s962_s1, 4  ;;  %s633_s6 = int_to_ptr.vmem [resolvable:$true] %s632_s6 }
  0x29   :  { %v329_v12 = vsub.f32 %v297_v6, %v313_v8  ;;  %v299_v13 = vmul.f32 %v58_v4, %v58_v4  ;;  %v300_v15 = vmul.f32 %v59_v9, %v59_v9  ;;  %v315_v16 = vmul.f32 2e-06, %v58_v4  ;;  %v60_v20 = vld [vmem:[#allocation5 + $0x20] sm:$0xff]  ;;  %726 = vmatprep.mubr.f32.mxu0 %v40_v18  ;;  %v63_v31 = vld [vmem:[#allocation5 + $0x38] sm:$0xff]  ;;  %v1010_v34 = vld [vmem:[#allocation2 + $0x10] sm:$0xff]  ;;  %s926_s7 = scalar_lea.vmem %s633_s6, 2048  ;;  %p931_p3 = scmp.lt.s32.totalorder %s633_s6, %s633_s6 }
  0x2a   :  { %786 = vmatprep.subr.bf16.mxu0 %v785_v5  ;;  %v330_v14 = vsub.f32 %v298_v7, %v314_v10  ;;  %v316_v17 = vmul.f32 2e-06, %v59_v9  ;;  %v793_v24 = vpack.c.bf16 %v61_v21, %v60_v20  ;;  %v301_v25 = vmul.f32 %v60_v20, %v60_v20  ;;  %v1012_v35 = vld [vmem:[#allocation2 + $0x18] sm:$0xff]  ;;  %v1018_v42 = vld [vmem:[#allocation2 + $0x8] sm:$0xff]  ;;  %v1028_v54 = vld [vmem:[#allocation2 + $0x20] sm:$0xff]  ;;  %p927_p2 = scmp.ne.s32.totalorder %s633_s6, %s926_s7  ;;  %p932_p4 = scmp.lt.s32.totalorder %s926_s7, %s926_s7 }
  0x2b   :  { %788 = vmatpush3.bf16.xpose.msra.mxu0 %v785_v5  ;;  %v331_v22 = vsub.f32 %v299_v13, %v315_v16  ;;  %v302_v26 = vmul.f32 %v61_v21, %v61_v21  ;;  %v317_v27 = vmul.f32 2e-06, %v60_v20  ;;  %v318_v28 = vmul.f32 2e-06, %v61_v21  ;;  %v1025_v51 = vld [vmem:[#allocation2 + $0x28] sm:$0xff]  ;;  %v64_v61 = vld [vmem:[#allocation5 + $0x40] sm:$0xff] }
  0x2c   :  { %790 = vmatprep.subr.bf16.mxu0 %v789_v11  ;;  %v818_v19 = vpack.c.bf16 %v330_v14, %v329_v12  ;;  %v332_v23 = vsub.f32 %v300_v15, %v316_v17  ;;  %v219_v36 = vmul.f32 %v1010_v34, %v1010_v34  ;;  %v235_v37 = vmul.f32 2e-06, %v1010_v34  ;;  %v65_v62 = vld [vmem:[#allocation5 + $0x48] sm:$0xff]  ;;  %v1036_v1 = vld [vmem:[#allocation2 + $0x38] sm:$0xff]  ;;  %v1038_v3 = vld [vmem:[#allocation2 + $0x30] sm:$0xff]  ;;  %p933_p5 = por %p932_p4, %p931_p3 }
  0x2d   :  { %v333_v32 = vsub.f32 %v301_v25, %v317_v27  ;;  %v334_v33 = vsub.f32 %v302_v26, %v318_v28  ;;  %v217_v38 = vmul.f32 %v40_v18, %v40_v18  ;;  %v233_v39 = vmul.f32 2e-06, %v40_v18  ;;  %v1047_v15 = vld [vmem:[#allocation2 + $0x48] sm:$0xff]  ;;  %v1049_v17 = vld [vmem:[#allocation2 + $0x40] sm:$0xff]  ;;  %v67_v25 = vld [vmem:[#allocation5 + $0x58] sm:$0xff] }
  0x2e   :  { %819 = vmatpush3.bf16.xpose.msra.mxu1 %v818_v19  ;;  %v821_v29 = vpack.c.bf16 %v332_v23, %v331_v22  ;;  %v797_v40 = vpack.c.bf16 %v63_v31, %v62_v30  ;;  %v319_v41 = vmul.f32 2e-06, %v62_v30  ;;  %v220_v43 = vmul.f32 %v1012_v35, %v1012_v35  ;;  %v1057_v27 = vld [vmem:[#allocation2 + $0x58] sm:$0xff]  ;;  %p934_p6 = pnand %p933_p5, %p927_p2 }
  0x2f   :  { %820 = vmatprep.subr.bf16.mxu1 %v958_v0  ;;  %v251_v44 = vadd.f32 %v235_v37, %v219_v36  ;;  %v249_v45 = vadd.f32 %v233_v39, %v217_v38  ;;  %v236_v46 = vmul.f32 2e-06, %v1012_v35  ;;  %v218_v47 = vmul.f32 %v1018_v42, %v1018_v42 }
  0x30   :  { %v303_v48 = vmul.f32 %v62_v30, %v62_v30  ;;  %v304_v49 = vmul.f32 %v63_v31, %v63_v31  ;;  %v320_v50 = vmul.f32 2e-06, %v63_v31  ;;  %v234_v52 = vmul.f32 2e-06, %v1018_v42 }
  0x31   :  { %v824_v53 = vpack.c.bf16 %v334_v33, %v333_v32  ;;  %269 = vadd.xlane.f32.xlu1 %v251_v44  ;;  %v252_v55 = vadd.f32 %v236_v46, %v220_v43  ;;  %v222_v56 = vmul.f32 %v1025_v51, %v1025_v51  ;;  %v238_v57 = vmul.f32 2e-06, %v1025_v51  ;;  %265 = vadd.xlane.f32.xlu0 %v249_v45  ;;  %v1068_v44 = vld [vmem:[#allocation2 + $0x68] sm:$0xff]  ;;  %v1070_v46 = vld [vmem:[#allocation2 + $0x60] sm:$0xff] }
  0x32   :  { %v250_v58 = vadd.f32 %v234_v52, %v218_v47  ;;  %v221_v59 = vmul.f32 %v1028_v54, %v1028_v54  ;;  %v237_v60 = vmul.f32 2e-06, %v1028_v54  ;;  %v335_v63 = vsub.f32 %v303_v48, %v319_v41 }
  0x33   :  { %792 = vmatpush3.bf16.xpose.msra.mxu0 %v789_v11  ;;  %v336_v2 = vsub.f32 %v304_v49, %v320_v50  ;;  %v254_v4 = vadd.f32 %v238_v57, %v222_v56  ;;  %v224_v5 = vmul.f32 %v1036_v1, %v1036_v1  ;;  %v240_v6 = vmul.f32 2e-06, %v1036_v1  ;;  %v69_v56 = vld [vmem:[#allocation5 + $0x68] sm:$0xff] }
  0x34   :  { %794 = vmatprep.subr.bf16.mxu0 %v793_v24  ;;  %v801_v7 = vpack.c.bf16 %v65_v62, %v64_v61  ;;  %v253_v8 = vadd.f32 %v237_v60, %v221_v59  ;;  %v223_v9 = vmul.f32 %v1038_v3, %v1038_v3  ;;  %v239_v10 = vmul.f32 2e-06, %v1038_v3  ;;  %v54_v60 = vld [vmem:[#allocation2 + $0x70] sm:$0xff] }
  0x35   :  { %271 = vadd.xlane.f32.xlu1 %v252_v55  ;;  %267 = vadd.xlane.f32.xlu0 %v250_v58  ;;  %v305_v11 = vmul.f32 %v64_v61, %v64_v61  ;;  %v306_v12 = vmul.f32 %v65_v62, %v65_v62  ;;  %v321_v13 = vmul.f32 2e-06, %v64_v61  ;;  %v322_v14 = vmul.f32 2e-06, %v65_v62  ;;  %v68_v55 = vld [vmem:[#allocation5 + $0x60] sm:$0xff]  ;;  %v1078_v58 = vld [vmem:[#allocation2 + $0x78] sm:$0xff] }
  0x36   :  { %822 = vmatpush3.bf16.xpose.msra.mxu1 %v821_v29  ;;  %v827_v16 = vpack.c.bf16 %v336_v2, %v335_v63  ;;  %v256_v18 = vadd.f32 %v240_v6, %v224_v5  ;;  %v226_v19 = vmul.f32 %v1047_v15, %v1047_v15  ;;  %v242_v20 = vmul.f32 2e-06, %v1047_v15  ;;  %v1059_v29 = vld [vmem:[#allocation2 + $0x50] sm:$0xff] }
  0x37   :  { %823 = vmatprep.subr.bf16.mxu1 %v958_v0  ;;  %v255_v21 = vadd.f32 %v239_v10, %v223_v9  ;;  %v225_v22 = vmul.f32 %v1049_v17, %v1049_v17  ;;  %v241_v23 = vmul.f32 2e-06, %v1049_v17  ;;  %v337_v26 = vsub.f32 %v305_v11, %v321_v13 }
  0x38   :  { %v338_v28 = vsub.f32 %v306_v12, %v322_v14  ;;  %v258_v30 = vadd.f32 %v242_v20, %v226_v19  ;;  %v228_v31 = vmul.f32 %v1057_v27, %v1057_v27  ;;  %v244_v32 = vmul.f32 2e-06, %v1057_v27  ;;  %v70_v14 = vld [vmem:[#allocation5 + $0x70] sm:$0xff] }
  0x39   :  { %275 = vadd.xlane.f32.xlu1 %v254_v4  ;;  %273 = vadd.xlane.f32.xlu0 %v253_v8  ;;  %v257_v36 = vadd.f32 %v241_v23, %v225_v22  ;;  %v227_v37 = vmul.f32 %v1059_v29, %v1059_v29  ;;  %v243_v38 = vmul.f32 2e-06, %v1059_v29  ;;  %v324_v43 = vmul.f32 2e-06, %v67_v25 }
  0x3a   :  { %v830_v45 = vpack.c.bf16 %v338_v28, %v337_v26  ;;  %v260_v47 = vadd.f32 %v244_v32, %v228_v31  ;;  %v230_v48 = vmul.f32 %v1068_v44, %v1068_v44  ;;  %v246_v49 = vmul.f32 2e-06, %v1068_v44 }
  0x3b   :  { %796 = vmatpush3.bf16.xpose.msra.mxu0 %v793_v24  ;;  %v66_v24 = vld [vmem:[#allocation5 + $0x50] sm:$0xff]  ;;  %v259_v50 = vadd.f32 %v243_v38, %v227_v37  ;;  %v229_v52 = vmul.f32 %v1070_v46, %v1070_v46  ;;  %v232_v62 = vmul.f32 %v1078_v58, %v1078_v58  ;;  %v248_v63 = vmul.f32 2e-06, %v1078_v58 }
  0x3c   :  { %798 = vmatprep.subr.bf16.mxu0 %v797_v40  ;;  %v805_v33 = vpack.c.bf16 %v67_v25, %v66_v24  ;;  %v307_v39 = vmul.f32 %v66_v24, %v66_v24  ;;  %v323_v41 = vmul.f32 2e-06, %v66_v24  ;;  %v262_v61 = vadd.f32 %v246_v49, %v230_v48 }
  0x3d   :  { %279 = vadd.xlane.f32.xlu1 %v256_v18  ;;  %277 = vadd.xlane.f32.xlu0 %v255_v21  ;;  %v809_v2 = vpack.c.bf16 %v69_v56, %v68_v55  ;;  %v231_v5 = vmul.f32 %v54_v60, %v54_v60  ;;  %v247_v6 = vmul.f32 2e-06, %v54_v60  ;;  %v310_v8 = vmul.f32 %v69_v56, %v69_v56 }
  0x3e   :  { %825 = vmatpush3.bf16.xpose.msra.mxu1 %v824_v53  ;;  %v245_v53 = vmul.f32 2e-06, %v1070_v46  ;;  %v339_v57 = vsub.f32 %v307_v39, %v323_v41  ;;  %v325_v10 = vmul.f32 2e-06, %v68_v55  ;;  %v326_v11 = vmul.f32 2e-06, %v69_v56 }
  0x3f   :  { %826 = vmatprep.subr.bf16.mxu1 %v958_v0  ;;  %v264_v12 = vadd.f32 %v248_v63, %v232_v62  ;;  %v263_v13 = vadd.f32 %v247_v6, %v231_v5  ;;  %v311_v21 = vmul.f32 %v70_v14, %v70_v14  ;;  %v327_v24 = vmul.f32 2e-06, %v70_v14 }
  0x40   :  { %v261_v4 = vadd.f32 %v245_v53, %v229_v52  ;;  %v342_v19 = vsub.f32 %v310_v8, %v326_v11  ;;  %v961_v31 = vmov 1.0  }
  0x41   :  { %283 = vadd.xlane.f32.xlu1 %v258_v30  ;;  %281 = vadd.xlane.f32.xlu0 %v257_v36  ;;  %v343_v26 = vsub.f32 %v311_v21, %v327_v24 }
  0x43   :  { %800 = vmatpush3.bf16.xpose.msra.mxu0 %v797_v40  ;;  %v308_v40 = vmul.f32 %v67_v25, %v67_v25 }
  0x44   :  { %802 = vmatprep.subr.bf16.mxu0 %v801_v7 }
  0x45   :  { %v340_v59 = vsub.f32 %v308_v40, %v324_v43  ;;  %287 = vadd.xlane.f32.xlu1 %v260_v47  ;;  %285 = vadd.xlane.f32.xlu0 %v259_v50 }
  0x46   :  { %828 = vmatpush3.bf16.xpose.msra.mxu1 %v827_v16  ;;  %v71_v16 = vld [vmem:[#allocation5 + $0x78] sm:$0xff] }
  0x47   :  { %829 = vmatprep.subr.bf16.mxu1 %v958_v0  ;;  %v833_v9 = vpack.c.bf16 %v340_v59, %v339_v57  ;;  %v813_v20 = vpack.c.bf16 %v71_v16, %v70_v14  ;;  %v312_v23 = vmul.f32 %v71_v16, %v71_v16  ;;  %v328_v25 = vmul.f32 2e-06, %v71_v16 }
  0x49   :  { %291 = vadd.xlane.f32.xlu1 %v262_v61  ;;  %289 = vadd.xlane.f32.xlu0 %v261_v4  ;;  %v344_v28 = vsub.f32 %v312_v23, %v328_v25 }
  0x4b   :  { %804 = vmatpush3.bf16.xpose.msra.mxu0 %v801_v7  ;;  %v309_v7 = vmul.f32 %v68_v55, %v68_v55  ;;  %v839_v30 = vpack.c.bf16 %v344_v28, %v343_v26 }
  0x4c   :  { %806 = vmatprep.subr.bf16.mxu0 %v805_v33 }
  0x4d   :  { %v341_v18 = vsub.f32 %v309_v7, %v325_v10  ;;  %295 = vadd.xlane.f32.xlu1 %v264_v12  ;;  %293 = vadd.xlane.f32.xlu0 %v263_v13 }
  0x4e   :  { %831 = vmatpush3.bf16.xpose.msra.mxu1 %v830_v45 }
  0x4f   :  { %832 = vmatprep.subr.bf16.mxu1 %v958_v0  ;;  %v836_v22 = vpack.c.bf16 %v342_v19, %v341_v18 }
  0x53   :  { %808 = vmatpush3.bf16.xpose.msra.mxu0 %v805_v33 }
  0x54   :  { %810 = vmatprep.subr.bf16.mxu0 %v809_v2 }
  0x56   :  { %834 = vmatpush3.bf16.xpose.msra.mxu1 %v833_v9 }
  0x57   :  { %835 = vmatprep.subr.bf16.mxu1 %v958_v0 }
  0x5b   :  { %812 = vmatpush3.bf16.xpose.msra.mxu0 %v809_v2 }
  0x5c   :  { %814 = vmatprep.subr.bf16.mxu0 %v813_v20 }
  0x5e   :  { %837 = vmatpush3.bf16.xpose.msra.mxu1 %v836_v22 }
  0x5f   :  { %838 = vmatprep.subr.bf16.mxu1 %v958_v0 }
  0x63   :  { %816 = vmatpush3.bf16.xpose.msra.mxu0 %v813_v20 }
  0x66   :  { %840 = vmatpush3.bf16.xpose.msra.mxu1 %v839_v30 }
  0x6a   :  { %727 = vmatmul.mubr.f32.vlgmr.msra.gmra.mrb[0].mxu0 %v1018_v42 }
  0x6b   :  { %729 = vmatprep.mubr.f32.mxu0 %v1010_v34 }
  0x6d   :  { %783 = vmatmul.mubr.f32.vlgmr.msra.gmra.mrb[0].mxu1 %v961_v31 }
  0x6e   :  { %730 = vmatmul.mubr.f32.gmra.mrb[2].mxu0 %v1012_v35 }
  0x6f   :  { %732 = vmatprep.mubr.f32.mxu0 %v1028_v54 }
  0x72   :  { %733 = vmatmul.mubr.f32.gmra.mrb[4].mxu0 %v1025_v51 }
  0x73   :  { %735 = vmatprep.mubr.f32.mxu0 %v1038_v3  ;;  %v415_v3 = vlaneseq }
  0x76   :  { %736 = vmatmul.mubr.f32.gmra.mrb[6].mxu0 %v1036_v1 }
  0x77   :  { %738 = vmatprep.mubr.f32.mxu0 %v1049_v17  ;;  %v416_v17 = vshrl.u32 %v415_v3, 7 }
  0x79   :  { %v417_v36 = vsub.s32 0, %v416_v17 }
  0x7a   :  { %739 = vmatmul.mubr.f32.gmra.mrb[8].mxu0 %v1047_v15 }
  0x7b   :  { %741 = vmatprep.mubr.f32.mxu0 %v1059_v29 }
  0x7e   :  { %742 = vmatmul.mubr.f32.gmra.mrb[10].mxu0 %v1057_v27 }
  0x7f   :  { %744 = vmatprep.mubr.f32.mxu0 %v1070_v46 }
  0x82   :  { %745 = vmatmul.mubr.f32.gmra.mrb[12].mxu0 %v1068_v44 }
  0x83   :  { %747 = vmatprep.mubr.f32.mxu0 %v54_v60 }
  0x86   :  { %748 = vmatmul.mubr.f32.gmra.mrb[14].mxu0 %v1078_v58 }
  0xbe   :  { %v270_v0 = vpop.xlane.xlu1 %269  ;;  %v1100_v34 = vpop.xlane.xlu0 %265 }
  0xc2   :  { %v272_v35 = vpop.xlane.xlu1 %271  ;;  %v268_v42 = vpop.xlane.xlu0 %267 }
  0xc6   :  { %v276_v51 = vpop.xlane.xlu1 %275  ;;  %v274_v54 = vpop.xlane.xlu0 %273 }
  0xca   :  { %v280_v1 = vpop.xlane.xlu1 %279  ;;  %v278_v15 = vpop.xlane.xlu0 %277 }
  0xce   :  { %v284_v29 = vpop.xlane.xlu1 %283  ;;  %v282_v32 = vpop.xlane.xlu0 %281 }
  0xd2   :  { %v288_v37 = vpop.xlane.xlu1 %287  ;;  %v286_v47 = vpop.xlane.xlu0 %285 }
  0xd6   :  { %v292_v5 = vpop.xlane.xlu1 %291  ;;  %v290_v9 = vpop.xlane.xlu0 %289 }
  0xda   :  { %v296_v28 = vpop.xlane.xlu1 %295 }
 0x13d   :  { %v728_v27 = vpop.f32.mrb[0].mxu0 }
 0x13e   :  { %v138_v33 = vpop.f32.mrb[1].mxu0  ;;  %v436_v45 = vmul.f32 2.0, %v728_v27 }
 0x13f   :  { %v1118_v21 = vmul.f32 2.0, %v138_v33 }
 0x140   :  { %v411_v38 = vpop.f32.mrb[0].mxu1 }
 0x141   :  { %v731_v39 = vpop.f32.mrb[2].mxu0  ;;  %v1102_v40 = vrot.slane %v411_v38, %v417_v36  ;;  %v784_v44 = vpop.f32.mrb[1].mxu1 }
 0x142   :  { %v438_v41 = vmul.f32 2.0, %v731_v39  ;;  %v148_v43 = vpop.f32.mrb[3].mxu0 }
 0x143   :  { %v437_v46 = vmul.f32 2.0, %v148_v43  ;;  %v422_v48 = vadd.f32 %v1102_v40, %v272_v35  ;;  %v420_v49 = vadd.f32 %v1102_v40, %v268_v42  ;;  %v421_v50 = vadd.f32 %v1102_v40, %v270_v0  ;;  %v294_v42 = vpop.xlane.xlu0 %293 }
 0x144   :  { %v424_v52 = vadd.f32 %v1102_v40, %v276_v51  ;;  %v423_v55 = vadd.f32 %v1102_v40, %v274_v54  ;;  %v426_v7 = vadd.f32 %v1102_v40, %v280_v1  ;;  %v425_v13 = vadd.f32 %v1102_v40, %v278_v15 }
 0x145   :  { %v734_v53 = vpop.f32.mrb[4].mxu0  ;;  %v454_v56 = vsub.f32 %v422_v48, %v438_v41  ;;  %v452_v57 = vsub.f32 %v420_v49, %v436_v45  ;;  %v453_v58 = vsub.f32 %v421_v50, %v437_v46  ;;  %v428_v23 = vadd.f32 %v1102_v40, %v284_v29 }
 0x146   :  { %v440_v59 = vmul.f32 2.0, %v734_v53  ;;  %v158_v60 = vpop.f32.mrb[5].mxu0  ;;  %v427_v24 = vadd.f32 %v1102_v40, %v282_v32  ;;  %v1125_v26 = vadd.f32 %v1102_v40, %v288_v37  ;;  %v429_v1 = vadd.f32 %v1102_v40, %v286_v47 }
 0x147   :  { %v439_v61 = vmul.f32 2.0, %v158_v60  ;;  %v470_v62 = vadd.f32 3.2e-11, %v454_v56  ;;  %v468_v63 = vadd.f32 3.2e-11, %v452_v57  ;;  %v1134_v3 = vadd.f32 %v1102_v40, %v1100_v34 }
 0x148   :  { %v469_v2 = vadd.f32 3.2e-11, %v453_v58  ;;  %v456_v4 = vsub.f32 %v424_v52, %v440_v59  ;;  %v1138_v17 = vadd.f32 %v1102_v40, %v292_v5  ;;  %v1141_v29 = vadd.f32 %v1102_v40, %v290_v9 }
 0x149   :  { %v455_v6 = vsub.f32 %v423_v55, %v439_v61  ;;  %v737_v8 = vpop.f32.mrb[6].mxu0  ;;  %v1110_v10 = vmax.f32 %v470_v62, 0.0  ;;  %v1112_v11 = vmax.f32 %v468_v63, 0.0  ;;  %v1144_v27 = vadd.f32 %v1102_v40, %v296_v28 }
 0x14a   :  { %v1114_v12 = vmax.f32 %v469_v2, 0.0  ;;  %v168_v14 = vpop.f32.mrb[7].mxu0  ;;  %v472_v16 = vadd.f32 3.2e-11, %v456_v4  ;;  %v442_v19 = vmul.f32 2.0, %v737_v8  ;;  %v1150_v32 = vadd.f32 %v1102_v40, %v294_v42 }
 0x14b   :  { %v471_v18 = vadd.f32 3.2e-11, %v455_v6  ;;  %v441_v20 = vmul.f32 2.0, %v168_v14  ;;  %850 = vrsqrt.f32 %v1110_v10  ;;  %vm522_vm1 = vcmp.eq.f32.partialorder %v1110_v10, inf }
 0x14c   :  { %852 = vrsqrt.f32 %v1112_v11  ;;  %v1127_v30 = vmax.f32 %v472_v16, 0.0  ;;  %v458_v0 = vsub.f32 %v426_v7, %v442_v19  ;;  %vm524_vm2 = vcmp.eq.f32.partialorder %v1110_v10, 0.0 }
 0x14d   :  { %v740_v22 = vpop.f32.mrb[8].mxu0  ;;  %854 = vrsqrt.f32 %v1114_v12  ;;  %v1129_v31 = vmax.f32 %v471_v18, 0.0  ;;  %v457_v35 = vsub.f32 %v425_v13, %v441_v20  ;;  %v525_v39 = vand.u32 2147483648, %v1110_v10 }
 0x14e   :  { %v178_v25 = vpop.f32.mrb[9].mxu0  ;;  %v444_v51 = vmul.f32 2.0, %v740_v22  ;;  %856 = vrsqrt.f32 %v1127_v30  ;;  %v474_v33 = vadd.f32 3.2e-11, %v458_v0  ;;  %v451_v44 = vsub.f32 %v1134_v3, %v1118_v21 }
 0x14f   :  { %v443_v54 = vmul.f32 2.0, %v178_v25  ;;  %858 = vrsqrt.f32 %v1129_v31  ;;  %v473_v36 = vadd.f32 3.2e-11, %v457_v35  ;;  %vm508_vm3 = vcmp.eq.f32.partialorder %v1112_v11, inf }
 0x150   :  { %v460_v37 = vsub.f32 %v428_v23, %v444_v51  ;;  %vm510_vm4 = vcmp.eq.f32.partialorder %v1112_v11, 0.0  ;;  %v1157_v45 = vmax.f32 %v474_v33, 0.0  ;;  %v511_v56 = vand.u32 2147483648, %v1112_v11 }
 0x151   :  { %v743_v15 = vpop.f32.mrb[10].mxu0  ;;  %v459_v38 = vsub.f32 %v427_v24, %v443_v54  ;;  %v1159_v46 = vmax.f32 %v473_v36, 0.0  ;;  %vm515_vm5 = vcmp.eq.f32.partialorder %v1114_v12, inf  ;;  %vm517_vm6 = vcmp.eq.f32.partialorder %v1114_v12, 0.0 }
 0x152   :  { %v188_v34 = vpop.f32.mrb[11].mxu0  ;;  %v446_v41 = vmul.f32 2.0, %v743_v15  ;;  %v476_v47 = vadd.f32 3.2e-11, %v460_v37  ;;  %860 = vrsqrt.f32 %v1157_v45  ;;  %v518_v60 = vand.u32 2147483648, %v1114_v12 }
 0x153   :  { %v445_v43 = vmul.f32 2.0, %v188_v34  ;;  %v475_v48 = vadd.f32 3.2e-11, %v459_v38  ;;  %862 = vrsqrt.f32 %v1159_v46  ;;  %vm536_vm7 = vcmp.eq.f32.partialorder %v1127_v30, inf }
 0x154   :  { %v462_v49 = vsub.f32 %v1125_v26, %v446_v41  ;;  %vm538_vm8 = vcmp.eq.f32.partialorder %v1127_v30, 0.0  ;;  %v1181_v5 = vmax.f32 %v476_v47, 0.0  ;;  %v539_v20 = vand.u32 2147483648, %v1127_v30 }
 0x155   :  { %v851_v40 = vpop.eup %850  ;;  %v461_v50 = vsub.f32 %v429_v1, %v445_v43  ;;  %v746_v52 = vpop.f32.mrb[12].mxu0  ;;  %v1183_v6 = vmax.f32 %v475_v48, 0.0  ;;  %vm529_vm9 = vcmp.eq.f32.partialorder %v1129_v31, inf  ;;  %vm531_vm10 = vcmp.eq.f32.partialorder %v1129_v31, 0.0 }
 0x156   :  { %v853_v53 = vpop.eup %852  ;;  %v521_v55 = vmul.f32 %v851_v40, %v1110_v10  ;;  %v198_v57 = vpop.f32.mrb[13].mxu0  ;;  %864 = vrsqrt.f32 %v1181_v5  ;;  %v532_v21 = vand.u32 2147483648, %v1129_v31  ;;  %vm550_vm11 = vcmp.eq.f32.partialorder %v1157_v45, inf }
 0x157   :  { %v855_v58 = vpop.eup %854  ;;  %v507_v59 = vmul.f32 %v853_v53, %v1112_v11  ;;  %v477_v14 = vadd.f32 3.2e-11, %v461_v50  ;;  %866 = vrsqrt.f32 %v1183_v6  ;;  %v467_v22 = vadd.f32 3.2e-11, %v451_v44 }
 0x158   :  { %v523_v61 = vsel %vm522_vm1, %v1110_v10, %v521_v55  ;;  %v514_v62 = vmul.f32 %v855_v58, %v1114_v12  ;;  %v857_v8 = vpop.eup %856  ;;  %v478_v10 = vadd.f32 3.2e-11, %v462_v49  ;;  %v448_v0 = vmul.f32 2.0, %v746_v52 }
 0x159   :  { %v749_v63 = vpop.f32.mrb[14].mxu0  ;;  %v526_v2 = vsel %vm524_vm2, %v525_v39, %v523_v61  ;;  %v509_v4 = vsel %vm508_vm3, %v1112_v11, %v507_v59  ;;  %v859_v16 = vpop.eup %858  ;;  %v535_v19 = vmul.f32 %v857_v8, %v1127_v30  ;;  %v1209_v26 = vmax.f32 %v477_v14, 0.0 }
 0x15a   :  { %v208_v7 = vpop.f32.mrb[15].mxu0  ;;  %614 = vst [vmem:[#allocation7 + $0x18] sm:$0xff] %v526_v2  ;;  %v512_v9 = vsel %vm510_vm4, %v511_v56, %v509_v4  ;;  %v516_v13 = vsel %vm515_vm5, %v1114_v12, %v514_v62  ;;  %v528_v11 = vmul.f32 %v859_v16, %v1129_v31  ;;  %v1207_v25 = vmax.f32 %v478_v10, 0.0 }
 0x15b   :  { %612 = vst [vmem:[#allocation7 + $0x8] sm:$0xff] %v512_v9  ;;  %v519_v18 = vsel %vm517_vm6, %v518_v60, %v516_v13  ;;  %v537_v12 = vsel %vm536_vm7, %v1127_v30, %v535_v19  ;;  %v447_v35 = vmul.f32 2.0, %v198_v57  ;;  %v450_v42 = vmul.f32 2.0, %v749_v63 }
 0x15c   :  { %613 = vst [vmem:[#allocation7 + $0x10] sm:$0xff] %v519_v18  ;;  %v540_v23 = vsel %vm538_vm8, %v539_v20, %v537_v12  ;;  %v530_v24 = vsel %vm529_vm9, %v1129_v31, %v528_v11  ;;  %v861_v51 = vpop.eup %860  ;;  %vm552_vm12 = vcmp.eq.f32.partialorder %v1157_v45, 0.0  ;;  %v553_v54 = vand.u32 2147483648, %v1157_v45 }
 0x15d   :  { %616 = vst [vmem:[#allocation7 + $0x28] sm:$0xff] %v540_v23  ;;  %v533_v28 = vsel %vm531_vm10, %v532_v21, %v530_v24  ;;  %vm543_vm13 = vcmp.eq.f32.partialorder %v1159_v46, inf  ;;  %868 = vrsqrt.f32 %v1207_v25  ;;  %v863_v30 = vpop.eup %862  ;;  %v549_v31 = vmul.f32 %v861_v51, %v1157_v45 }
 0x15e   :  { %615 = vst [vmem:[#allocation7 + $0x20] sm:$0xff] %v533_v28  ;;  %vm545_vm14 = vcmp.eq.f32.partialorder %v1159_v46, 0.0  ;;  %v546_v1 = vand.u32 2147483648, %v1159_v46  ;;  %870 = vrsqrt.f32 %v1209_v26  ;;  %v542_v3 = vmul.f32 %v863_v30, %v1159_v46 }
 0x15f   :  { %vm564_vm15 = vcmp.eq.f32.partialorder %v1181_v5, inf  ;;  %v464_v15 = vsub.f32 %v1138_v17, %v448_v0  ;;  %v463_v34 = vsub.f32 %v1141_v29, %v447_v35  ;;  %v551_v33 = vsel %vm550_vm11, %v1157_v45, %v549_v31 }
 0x160   :  { %v466_v36 = vsub.f32 %v1144_v27, %v450_v42  ;;  %v449_v37 = vmul.f32 2.0, %v208_v7  ;;  %v483_v38 = vmax.f32 %v467_v22, 0.0  ;;  %v554_v39 = vsel %vm552_vm12, %v553_v54, %v551_v33  ;;  %v865_v17 = vpop.eup %864 }
 0x161   :  { %v544_v41 = vsel %vm543_vm13, %v1159_v46, %v542_v3  ;;  %v480_v43 = vadd.f32 3.2e-11, %v464_v15  ;;  %v479_v44 = vadd.f32 3.2e-11, %v463_v34  ;;  %618 = vst [vmem:[#allocation7 + $0x38] sm:$0xff] %v554_v39  ;;  %v867_v27 = vpop.eup %866  ;;  %v563_v45 = vmul.f32 %v865_v17, %v1181_v5 }
 0x162   :  { %v547_v29 = vsel %vm545_vm14, %v546_v1, %v544_v41  ;;  %v482_v40 = vadd.f32 3.2e-11, %v466_v36  ;;  %v465_v47 = vsub.f32 %v1150_v32, %v449_v37  ;;  %872 = vrsqrt.f32 %v483_v38 }
 0x163   :  { %617 = vst [vmem:[#allocation7 + $0x30] sm:$0xff] %v547_v29  ;;  %vm566_vm0 = vcmp.eq.f32.partialorder %v1181_v5, 0.0  ;;  %v496_v48 = vmax.f32 %v480_v43, 0.0  ;;  %v495_v49 = vmax.f32 %v479_v44, 0.0  ;;  %v567_v50 = vand.u32 2147483648, %v1181_v5 }
 0x164   :  { %v556_v52 = vmul.f32 %v867_v27, %v1183_v6  ;;  %vm557_vm1 = vcmp.eq.f32.partialorder %v1183_v6, inf  ;;  %v1240_v46 = vmax.f32 %v482_v40, 0.0  ;;  %v565_v32 = vsel %vm564_vm15, %v1181_v5, %v563_v45 }
 0x165   :  { %v560_v53 = vand.u32 2147483648, %v1183_v6  ;;  %874 = vrsqrt.f32 %v496_v48  ;;  %v481_v55 = vadd.f32 3.2e-11, %v465_v47  ;;  %v568_v56 = vsel %vm566_vm0, %v567_v50, %v565_v32 }
 0x166   :  { %v558_v57 = vsel %vm557_vm1, %v1183_v6, %v556_v52  ;;  %vm559_vm2 = vcmp.eq.f32.partialorder %v1183_v6, 0.0  ;;  %876 = vrsqrt.f32 %v495_v49  ;;  %620 = vst [vmem:[#allocation7 + $0x48] sm:$0xff] %v568_v56  ;;  %vm578_vm3 = vcmp.eq.f32.partialorder %v1207_v25, inf }
 0x167   :  { %v869_v58 = vpop.eup %868  ;;  %v561_v59 = vsel %vm559_vm2, %v560_v53, %v558_v57  ;;  %878 = vrsqrt.f32 %v1240_v46  ;;  %v581_v62 = vand.u32 2147483648, %v1207_v25  ;;  %v497_v2 = vmax.f32 %v481_v55, 0.0 }
 0x168   :  { %v871_v60 = vpop.eup %870  ;;  %619 = vst [vmem:[#allocation7 + $0x40] sm:$0xff] %v561_v59  ;;  %v577_v61 = vmul.f32 %v869_v58, %v1207_v25  ;;  %vm580_vm4 = vcmp.eq.f32.partialorder %v1207_v25, 0.0  ;;  %vm571_vm5 = vcmp.eq.f32.partialorder %v1209_v26, inf  ;;  %v574_v5 = vand.u32 2147483648, %v1209_v26 }
 0x169   :  { %v570_v63 = vmul.f32 %v871_v60, %v1209_v26  ;;  %vm573_vm6 = vcmp.eq.f32.partialorder %v1209_v26, 0.0  ;;  %880 = vrsqrt.f32 %v497_v2  ;;  %vm501_vm7 = vcmp.eq.f32.partialorder %v483_v38, inf }
 0x16a   :  { %v579_v4 = vsel %vm578_vm3, %v1207_v25, %v577_v61  ;;  %v504_v10 = vand.u32 2147483648, %v483_v38  ;;  %vm503_vm8 = vcmp.eq.f32.partialorder %v483_v38, 0.0  ;;  %vm592_vm9 = vcmp.eq.f32.partialorder %v496_v48, inf }
 0x16b   :  { %v582_v6 = vsel %vm580_vm4, %v581_v62, %v579_v4  ;;  %v572_v7 = vsel %vm571_vm5, %v1209_v26, %v570_v63  ;;  %v595_v11 = vand.u32 2147483648, %v496_v48  ;;  %vm594_vm10 = vcmp.eq.f32.partialorder %v496_v48, 0.0 }
 0x16c   :  { %v873_v8 = vpop.eup %872  ;;  %622 = vst [vmem:[#allocation7 + $0x58] sm:$0xff] %v582_v6  ;;  %v575_v9 = vsel %vm573_vm6, %v574_v5, %v572_v7  ;;  %vm585_vm11 = vcmp.eq.f32.partialorder %v495_v49, inf  ;;  %v588_v23 = vand.u32 2147483648, %v495_v49  ;;  %vm587_vm12 = vcmp.eq.f32.partialorder %v495_v49, 0.0 }
 0x16d   :  { %621 = vst [vmem:[#allocation7 + $0x50] sm:$0xff] %v575_v9  ;;  %v500_v13 = vmul.f32 %v873_v8, %v483_v38  ;;  %vm606_vm13 = vcmp.eq.f32.partialorder %v1240_v46, inf  ;;  %v609_v0 = vand.u32 2147483648, %v1240_v46  ;;  %vm608_vm14 = vcmp.eq.f32.partialorder %v1240_v46, 0.0 }
 0x16e   :  { %vm599_vm15 = vcmp.eq.f32.partialorder %v497_v2, inf  ;;  %v602_v30 = vand.u32 2147483648, %v497_v2  ;;  %vm601_vm0 = vcmp.eq.f32.partialorder %v497_v2, 0.0 }
 0x16f   :  { %v875_v14 = vpop.eup %874  ;;  %v502_v16 = vsel %vm501_vm7, %v483_v38, %v500_v13 }
 0x170   :  { %v877_v18 = vpop.eup %876  ;;  %v591_v19 = vmul.f32 %v875_v14, %v496_v48  ;;  %v505_v20 = vsel %vm503_vm8, %v504_v10, %v502_v16 }
 0x171   :  { %v584_v12 = vmul.f32 %v877_v18, %v495_v49  ;;  %611 = vst [vmem:[#allocation7] sm:$0xff] %v505_v20  ;;  %v879_v21 = vpop.eup %878 }
 0x172   :  { %v593_v22 = vsel %vm592_vm9, %v496_v48, %v591_v19  ;;  %v605_v26 = vmul.f32 %v879_v21, %v1240_v46 }
 0x173   :  { %v596_v24 = vsel %vm594_vm10, %v595_v11, %v593_v22  ;;  %v586_v25 = vsel %vm585_vm11, %v495_v49, %v584_v12  ;;  %v881_v35 = vpop.eup %880 }
 0x174   :  { %624 = vst [vmem:[#allocation7 + $0x68] sm:$0xff] %v596_v24  ;;  %v589_v28 = vsel %vm587_vm12, %v588_v23, %v586_v25  ;;  %v607_v42 = vsel %vm606_vm13, %v1240_v46, %v605_v26  ;;  %v598_v54 = vmul.f32 %v881_v35, %v497_v2 }
 0x175   :  { %623 = vst [vmem:[#allocation7 + $0x60] sm:$0xff] %v589_v28  ;;  %v610_v51 = vsel %vm608_vm14, %v609_v0, %v607_v42 }
 0x176   :  { %626 = vst [vmem:[#allocation7 + $0x78] sm:$0xff] %v610_v51  ;;  %v600_v31 = vsel %vm599_vm15, %v497_v2, %v598_v54 }
 0x177   :  { %v603_v1 = vsel %vm601_vm0, %v602_v30, %v600_v31 }
 0x178   :  { %625 = vst [vmem:[#allocation7 + $0x70] sm:$0xff] %v603_v1 }
 0x179   :  { %937 = shalt.err (!%p934_p6)
}
 0x17a   :  { %s938_s10 = scalar_lea.hbm %s1281_s2, 2048 }
 0x17b   :  { %p939_p7 = scmp.ne.s32.totalorder %s1281_s2, %s938_s10  ;;  %p942_p8 = scmp.lt.u32.totalorder %s938_s10, %s1281_s2 }
 0x17d   :  { %p944_p9 = pnand %p942_p8, %p939_p7 }
 0x17f   :  { %947 = shalt.err (!%p944_p9)
}
 0x180   :  { %638 = dma.vmem_to_hbm [thread:$0]  %s633_s6, 2048, %s1281_s2, [#allocation4], %s955_s19, %s955_s19, %s956_s20  }
 0x181   :  { %952 = dma.done.wait [#allocation4], 2048  }
 0x182   :  { %953 = vsyncadd [#allocation4], 4294965248 }
 0x183   :  { %642 = vsyncpa [#allocation3], 1 }
 0x184   :  { %643 = vsyncpa [#allocation6], 1 }
 0x185   :  { %644 = vsyncpa [#allocation4], 1 }

</bundles_post_ra>
